<compile_context>
chip_gen: v7x
topology: tpu7x:2x2x1
jax: 0.10.0
libtpu: 0.0.40
codegen_flags: <defaults>
</compile_context>

<pallas_src>
import functools
import math

import jax
import jax.numpy as jnp
from jax.experimental import pallas as pl
from jax.experimental.pallas import tpu as pltpu


_LANES = 128
_XLA_FASTPATH_MAX_ELEMS = 1 << 20  # below this a fused XLA multiply always wins


def _max_block_rows():
    """Generation-tuned row-block size for the streaming kernel."""
    try:
        kind = jax.devices()[0].device_kind.lower()
    except Exception:  # pragma: no cover - defensive
        kind = ""
    if "v4" in kind or "v5" in kind:
        # v5e default scoped VMEM is 16 MiB -> keep 1 MiB buffers
        # (2 in + 2 out double-buffered = 4 MiB total).
        return 2048
    # v6e / v7x: 4 MiB buffers double-buffered (16 MiB) fit the 32 MiB default
    # scoped VMEM and amortize the ~0.35 us per-grid-step overhead.
    return 8192


# ----------------------------------------------------------------------------
# Pallas kernel: folded solver step for identity dynamics f(X, u, s) = X.
# ----------------------------------------------------------------------------
def _scale_kernel(x_ref, o_ref, *, scale):
    # One VPU multiply per element; kernel is HBM-bandwidth bound.
    o_ref[...] = (x_ref[...] * scale).astype(o_ref.dtype)


def _solver_scale(solver, dt):
    dt = float(dt)  # dt is a Python float from __init__ (not traced)
    if solver == "rk4":
        # Exact algebraic fold of the classic RK4 stages applied to f(X) = X.
        return 1.0 + dt + dt * dt / 2.0 + dt ** 3 / 6.0 + dt ** 4 / 24.0
    if solver == "ef":
        return 1.0 + dt
    raise ValueError(f"unknown solver {solver!r}")


def _solver_step(solver, past_state, dt, *, force_pallas=False):
    """One ODE-solver step of the base motion model."""
    scale = _solver_scale(solver, dt)
    dtype = past_state.dtype
    total = math.prod(past_state.shape)

    use_pallas = force_pallas or total >= _XLA_FASTPATH_MAX_ELEMS
    if (not use_pallas) or (total % _LANES != 0):
        # Small / non-lane-aligned states: a fused XLA multiply beats any
        # kernel launch (no pad/slice HBM round trips, fuses into the caller).
        # TODO(synk): a masked pltpu.store in the last block could cover large
        # non-128-aligned totals fully in Pallas if that case ever matters.
        return (past_state * jnp.asarray(scale, dtype)).astype(dtype)

    # Lane-dense layout: contiguous flatten to (rows, 128) is a free metadata
    # reshape (total is a multiple of 128) -> unmasked full-lane vst's.
    rows = total // _LANES
    max_rows = _max_block_rows()
    # block_rows is either the full row extent (any value allowed) or a
    # multiple of 8, satisfying the (8, 128) BlockSpec constraint. The final
    # partial block (rows % block_rows != 0) is masked by Pallas — no padding.
    block_rows = rows if rows <= max_rows else max_rows
    grid = (pl.cdiv(rows, block_rows),)

    x2d = past_state.reshape(rows, _LANES)

    out2d = pl.pallas_call(
        functools.partial(_scale_kernel, scale=scale),
        out_shape=jax.ShapeDtypeStruct((rows, _LANES), dtype),
        grid=grid,
        in_specs=[pl.BlockSpec((block_rows, _LANES), lambda i: (i, 0))],
        out_specs=pl.BlockSpec((block_rows, _LANES), lambda i: (i, 0)),
        compiler_params=pltpu.CompilerParams(
            dimension_semantics=("parallel",),  # shard row-blocks across TCs
        ),
        cost_estimate=pl.CostEstimate(
            flops=total,
            transcendentals=0,
            bytes_accessed=2 * total * dtype.itemsize,
        ),
    )(x2d)

    return out2d.reshape(past_state.shape)


# ----------------------------------------------------------------------------
# JAX-side module mirroring the PyTorch MotionModelBase
# ----------------------------------------------------------------------------
class MotionModelBase:
    def __init__(self, solver="rk4", dt=0.04, n_states=4, mixtures=8,
                 static_f_dim=6, *u_lims):
        self.dt = dt
        self.mixtures = mixtures
        self.n_states = n_states
        self.static_f_dim = static_f_dim
        self.n_inputs = len(u_lims)
        self.u_lims = u_lims
        # Hardtanh(-u_lim, u_lim) equivalents (unused by forward(), parity only).
        self.u_constrain = [
            (lambda lim: (lambda u: jnp.clip(u, -lim, lim)))(u_lim)
            for u_lim in u_lims
        ]
        self.solver = solver
        self.force_pallas = False  # demo/testing hook; "auto" dispatch by default
        # Deterministic (non-trainable) parameter, exactly as in __init__.
        self.G = self.build_inp_transition_matrix()

    def build_inp_transition_matrix(self):
        G = jnp.zeros((1, self.mixtures, self.n_states, self.n_inputs),
                      dtype=jnp.float32)
        idx_offset = self.n_states - self.n_inputs
        if self.n_inputs >= 1:
            G = G.at[..., idx_offset, 0].set(self.dt)
        if self.n_inputs >= 2:
            G = G.at[..., idx_offset + 1, 1].set(self.dt)
        return G

    def input_transition_matrix(self, X, u):
        batch_size = X.shape[0]
        G = jnp.broadcast_to(self.G, (batch_size,) + self.G.shape[1:])
        return G, jnp.swapaxes(G, -2, -1)

    # TODO(synk): state_transition_matrix uses torch.func vmap(jacrev(...));
    # for the base (identity) dynamics the Jacobian is analytic ((1+dt)*I) and
    # not part of forward(), so it is not implemented as a kernel here.

    def forward(self, past_state, inputs, static_f):
        # Base-class dynamics ignore `inputs` / `static_f`; they are not DMA'd.
        next_state = _solver_step(self.solver, past_state, self.dt,
                                  force_pallas=self.force_pallas)
        return next_state, inputs


# ----------------------------------------------------------------------------
# Reference (plain JAX, un-folded RK4 chain) for a correctness check
# ----------------------------------------------------------------------------
def _rk4_reference(x, dt):
    k1 = x
    k2 = x + dt * 0.5 * k1
    k3 = x + dt * 0.5 * k2
    k4 = x + dt * k3
    return x + (dt / 6.0) * (k1 + 2.0 * k2 + 2.0 * k3 + k4)


if __name__ == "__main__":
    # Shapes consistent with the module:
    #   mixtures M=8, n_states=4, n_inputs=2, static_f_dim=6
    N, M, n_states, n_inputs, static_f_dim = 2, 8, 4, 2, 6
    dt = 0.04

    key = jax.random.PRNGKey(0)
    k1, k2, k3, k4 = jax.random.split(key, 4)
    past_state = jax.random.normal(k1, (N, M, n_states), dtype=jnp.float32)
    inputs = jax.random.normal(k2, (N, M, n_inputs), dtype=jnp.float32)
    static_f = jax.random.normal(k3, (N, M, static_f_dim), dtype=jnp.float32)

    model = MotionModelBase("rk4", dt, n_states, M, static_f_dim, 1.0, 0.5)

    # 1) Default dispatch: tiny state -> XLA fast path (per review).
    next_state, inputs_out = model.forward(past_state, inputs, static_f)
    next_state = jax.block_until_ready(next_state)
    ref = _rk4_reference(past_state, dt)
    assert next_state.shape == past_state.shape
    assert inputs_out.shape == inputs.shape
    assert jnp.allclose(next_state, ref, atol=1e-5, rtol=1e-5)
    assert jnp.array_equal(inputs_out, inputs)

    # 2) Pallas streaming-kernel path: lane-aligned batch of rollouts
    #    (64*8*4 = 2048 elements, multiple of 128), kernel forced for the demo.
    Np = 64
    past_state_big = jax.random.normal(k4, (Np, M, n_states), dtype=jnp.float32)
    inputs_big = jnp.zeros((Np, M, n_inputs), dtype=jnp.float32)
    static_f_big = jnp.zeros((Np, M, static_f_dim), dtype=jnp.float32)

    model_pallas = MotionModelBase("rk4", dt, n_states, M, static_f_dim, 1.0, 0.5)
    model_pallas.force_pallas = True
    next_big, inputs_big_out = model_pallas.forward(
        past_state_big, inputs_big, static_f_big)
    next_big = jax.block_until_ready(next_big)
    ref_big = _rk4_reference(past_state_big, dt)
    assert next_big.shape == past_state_big.shape
    assert jnp.allclose(next_big, ref_big, atol=1e-5, rtol=1e-5)
    assert jnp.array_equal(inputs_big_out, inputs_big)

    # Euler-forward solver through the same kernel.
    next_ef = jax.block_until_ready(
        _solver_step("ef", past_state_big, dt, force_pallas=True))
    assert jnp.allclose(next_ef, past_state_big * (1.0 + dt),
                        atol=1e-6, rtol=1e-6)

    print("KERNEL_OK")
</pallas_src>

<mosaic_0001>
module attributes {stable_mosaic.version = 11 : i64} {
  func.func @_scale_kernel(%arg0: i32, %arg1: memref<16x128xf32, #tpu.memory_space<vmem>>, %arg2: memref<16x128xf32, #tpu.memory_space<vmem>>) attributes {dimension_semantics = [#tpu.dimension_semantics<parallel>], iteration_bounds = array<i64: 1>, scalar_prefetch = 0 : i64, scratch_operands = 0 : i64, tpu.core_type = #tpu.core_type<tc>, window_params = [{transform_indices = @transform_0, window_bounds = array<i64: 16, 128>}, {transform_indices = @transform_1, window_bounds = array<i64: 16, 128>}]} {
    %c0 = arith.constant 0 : index
    %c0_0 = arith.constant 0 : index
    %0 = vector.load %arg1[%c0, %c0_0] : memref<16x128xf32, #tpu.memory_space<vmem>>, vector<16x128xf32>
    %cst = arith.constant 1.04081082 : f32
    %1 = vector.broadcast %cst : f32 to vector<16x128xf32>
    %2 = arith.mulf %0, %1 : vector<16x128xf32>
    %c0_1 = arith.constant 0 : index
    %c0_2 = arith.constant 0 : index
    %3 = vector.load %arg2[%c0_1, %c0_2] : memref<16x128xf32, #tpu.memory_space<vmem>>, vector<16x128xf32>
    tpu.vector_store %arg2[%c0_1, %c0_2], %2 {strides = array<i32>} : memref<16x128xf32, #tpu.memory_space<vmem>>, vector<16x128xf32>,
    return
  }
  func.func @transform_0(%arg0: i32) -> (i32, i32) {
    %c0_i32 = arith.constant 0 : i32
    %c0_i32_0 = arith.constant 0 : i32
    return %arg0, %c0_i32 : i32, i32
  }
  func.func @transform_1(%arg0: i32) -> (i32, i32) {
    %c0_i32 = arith.constant 0 : i32
    %c0_i32_0 = arith.constant 0 : i32
    return %arg0, %c0_i32 : i32, i32
  }
}

</mosaic_0001>

<bundles_post_ra>
// kernel: tpu_custom_call.1
= control target key start
LH: loop header
LB: loop body
LE: loop exit
PB: predicated region body
PF: predicated region fallthrough
CT: control target
= control target key end

     0   :  { %6 = vsyncpa [#allocation3], 0  ;;  %s136_s0 = inlined_call_operand.hbm [shape: f32[16,128], index: 0, kind: input, shape index: {}]   ;;  %s137_s1 = inlined_call_operand.hbm [shape: f32[16,128], index: 1, kind: output, shape index: {}]  }
   0x1   :  { %7 = vsyncpa [#allocation4], 0  ;;  %s98_s6 = smov [#allocation2]   ;;  %s50_s10 = scalar_lea.hbm %s136_s0, 256 }
   0x2   :  { %s13_s7 = sshll.u32 %s98_s6, 4  ;;  %p51_p0 = scmp.ne.s32.totalorder %s136_s0, %s50_s10  ;;  %s14_s7 = int_to_ptr.vmem [resolvable:$true] %s13_s7 }
   0x3   :  { %p54_p1 = scmp.lt.u32.totalorder %s50_s10, %s136_s0 }
   0x5   :  { %p56_p2 = pnand %p54_p1, %p51_p0 }
   0x7   :  { %59 = shalt.err (!%p56_p2)
}
   0x8   :  { %s60_s15 = scalar_lea.vmem %s14_s7, 256  ;;  %p65_p4 = scmp.lt.s32.totalorder %s14_s7, %s14_s7 }
   0x9   :  { %p61_p3 = scmp.ne.s32.totalorder %s14_s7, %s60_s15  ;;  %p66_p5 = scmp.lt.s32.totalorder %s60_s15, %s60_s15 }
   0xb   :  { %p67_p6 = por %p66_p5, %p65_p4 }
   0xd   :  { %p68_p7 = pnand %p67_p6, %p61_p3 }
   0xf   :  { %71 = shalt.err (!%p68_p7)
}
  0x10   :  { %s99_s16 = smov 128   ;;  %s100_s17 = smov 8  }
  0x11   :  { %19 = dma.hbm_to_vmem [thread:$0]  %s136_s0, 256, %s14_s7, [#allocation3], %s99_s16, %s99_s16, %s100_s17  }
  0x12   :  { %94 = dma.done.wait [#allocation3], 256  }
  0x13   :  { %95 = vsyncadd [#allocation3], 4294967040  ;;  %s101_s20 = smov [#allocation5]   ;;  %v23_v0 = vld [vmem:[#allocation2] sm:$0xff]  ;;  %v24_v1 = vld [vmem:[#allocation2 + $0x8] sm:$0xff] }
  0x14   :  { %s34_s21 = sshll.u32 %s101_s20, 4  ;;  %v25_v2 = vmul.f32 1.0408108, %v23_v0  ;;  %v26_v3 = vmul.f32 1.0408108, %v24_v1  ;;  %s35_s21 = int_to_ptr.vmem [resolvable:$true] %s34_s21 }
  0x15   :  { %s72_s22 = scalar_lea.vmem %s35_s21, 256  ;;  %p77_p9 = scmp.lt.s32.totalorder %s35_s21, %s35_s21 }
  0x16   :  { %27 = vst [vmem:[#allocation5] sm:$0xff] %v25_v2  ;;  %28 = vst [vmem:[#allocation5 + $0x8] sm:$0xff] %v26_v3  ;;  %p73_p8 = scmp.ne.s32.totalorder %s35_s21, %s72_s22  ;;  %p78_p10 = scmp.lt.s32.totalorder %s72_s22, %s72_s22 }
  0x18   :  { %p79_p11 = por %p78_p10, %p77_p9 }
  0x1a   :  { %p80_p12 = pnand %p79_p11, %p73_p8 }
  0x1c   :  { %83 = shalt.err (!%p80_p12)
}
  0x1d   :  { %s84_s24 = scalar_lea.hbm %s137_s1, 256 }
  0x1e   :  { %p85_p13 = scmp.ne.s32.totalorder %s137_s1, %s84_s24  ;;  %p88_p0 = scmp.lt.u32.totalorder %s84_s24, %s137_s1 }
  0x20   :  { %p90_p1 = pnand %p88_p0, %p85_p13 }
  0x22   :  { %93 = shalt.err (!%p90_p1)
}
  0x23   :  { %40 = dma.vmem_to_hbm [thread:$0]  %s35_s21, 256, %s137_s1, [#allocation4], %s99_s16, %s99_s16, %s100_s17  }
  0x24   :  { %96 = dma.done.wait [#allocation4], 256  }
  0x25   :  { %97 = vsyncadd [#allocation4], 4294967040 }
  0x26   :  { %44 = vsyncpa [#allocation3], 1 }
  0x27   :  { %45 = vsyncpa [#allocation4], 1 }

</bundles_post_ra>
